<compile_context>
chip_gen: v7x
topology: tpu7x:2x2x1
jax: 0.10.0
libtpu: 0.0.40
codegen_flags: <defaults>
</compile_context>

<pallas_src>
import functools

import jax
import jax.numpy as jnp
from jax import lax
from jax.experimental import pallas as pl
from jax.experimental.pallas import tpu as pltpu


_VMEM_CAP_CACHE = None


def _vmem_capacity_bytes():
    global _VMEM_CAP_CACHE
    if _VMEM_CAP_CACHE is None:
        cap = 64 * 1024 * 1024               # conservative fallback (v7x per-TC VMEM)
        try:
            cap = int(pltpu.get_tpu_info().vmem_capacity_bytes)
        except Exception:
            pass
        _VMEM_CAP_CACHE = cap
    return _VMEM_CAP_CACHE


def _vmem_limit_bytes():
    # ~75% of physical VMEM as the scoped limit: ~96 MiB on v5e/v6e (128 MiB
    # physical, 16/32 MiB default scoped), ~48 MiB on v7x (64 MiB physical).
    return (_vmem_capacity_bytes() * 3) // 4


def _choose_tiling(n, ch, itemsize, tile_override=None):
    """Chip/VMEM/dtype-aware N (= h*w) reduction tile.  Returns (tile_n, n_tiles)."""
    if tile_override is not None:
        t = int(min(tile_override, n))
        if t < n:                            # multi-tile blocks must be lane-aligned
            t = max(128, (t // 128) * 128)
        return t, -(-n // t)
    budget = (_vmem_capacity_bytes() * 3) // 5   # resident buffers <= ~60% of VMEM
    fixed = 4 * ch * ch * 4                      # resident gram/acc + target-gram buffers
    per_col = 2 * ch * itemsize                  # double-buffered (ch, tile) feature block
    t = (budget - fixed) // per_col
    t = min(max((t // 128) * 128, 512), 8192)    # 128-aligned; cap keeps ch<=512 f32 safe on v7x
    if n <= t:
        return n, 1                              # single full-extent tile: no pad, no mask
    return t, -(-n // t)


def _mask_and_cast(ft, tile_start_limit, needs_mask, mxu_dtype):
    """Zero the ragged/out-of-range tail columns, then optionally cast for the MXU."""
    if needs_mask:
        col = lax.broadcasted_iota(jnp.int32, ft.shape, 1)
        ft = jnp.where(col < tile_start_limit, ft, jnp.zeros_like(ft))
    if mxu_dtype is not None and ft.dtype != mxu_dtype:
        ft = ft.astype(mxu_dtype)                # VPU cast hides under the matmul (v6e/v7x)
    return ft


# ---------------------------------------------------------------------------
# Kernel 1: partial gram matrices.
#   grid = (n_split, bs, tiles_per_split); for each (s, b) the (ch, ch) output
#   block is resident across the reduction axis and accumulated in place,
#   scaled by 1/(ch*h*w) on the last step.  Wrapper sums over the split axis.
# ---------------------------------------------------------------------------
def _partial_gram_kernel(f_ref, g_ref, *, inv_scale, n, tile_n, tiles_per_split,
                         needs_mask, mxu_dtype):
    s = pl.program_id(0)
    k = pl.program_id(2)

    @pl.when(k == 0)
    def _():
        g_ref[...] = jnp.zeros_like(g_ref)

    ft = f_ref[...]                               # (ch, tile_n), native dtype
    gidx = s * tiles_per_split + k                # unclamped global tile index
    ft = _mask_and_cast(ft, n - gidx * tile_n, needs_mask, mxu_dtype)
    # Contract the last dim of both operands -> (ch, ch), no f.T relayout.
    g_ref[...] += lax.dot_general(
        ft, ft, dimension_numbers=(((1,), (1,)), ((), ())),
        preferred_element_type=jnp.float32)

    @pl.when(k == pl.num_programs(2) - 1)
    def _():
        g_ref[...] = g_ref[...] * inv_scale


def gram_matrix(x_nchw, *, mxu_dtype=None, tile_n=None):
    """g[b] = f[b] @ f[b]^T / (ch*h*w), f = x.reshape(bs, ch, h*w).  f32 output."""
    bs, ch, h, w = x_nchw.shape
    n = h * w
    f = x_nchw.reshape(bs, ch, n)                 # free: merges contiguous dims
    t_n, n_tiles = _choose_tiling(n, ch, f.dtype.itemsize, tile_n)

    # Split-K: give v7x's 2nd TensorCore work when the batch axis alone can't.
    n_split = 2 if (bs % 2 == 1 and n_tiles >= 2) else 1
    tps = -(-n_tiles // n_split)
    clamp = (n_split * tps != n_tiles)
    needs_mask = (n % t_n != 0) or clamp
    last_tile = n_tiles - 1

    def f_index(s, b, k):
        g = s * tps + k
        if clamp:                                  # duplicate tile is fully masked in-kernel
            g = jnp.minimum(g, last_tile)
        return (b, 0, g)

    kernel = functools.partial(
        _partial_gram_kernel, inv_scale=1.0 / (ch * n), n=n, tile_n=t_n,
        tiles_per_split=tps, needs_mask=needs_mask, mxu_dtype=mxu_dtype)

    partial = pl.pallas_call(
        kernel,
        out_shape=jax.ShapeDtypeStruct((n_split, bs, ch, ch), jnp.float32),
        grid_spec=pltpu.PrefetchScalarGridSpec(
            num_scalar_prefetch=0,
            grid=(n_split, bs, tps),
            in_specs=[pl.BlockSpec((None, ch, t_n), f_index)],
            out_specs=pl.BlockSpec((None, None, ch, ch), lambda s, b, k: (s, b, 0, 0)),
        ),
        compiler_params=pltpu.CompilerParams(
            dimension_semantics=("parallel", "parallel", "arbitrary"),
            vmem_limit_bytes=_vmem_limit_bytes()),
        cost_estimate=pl.CostEstimate(
            flops=2 * bs * ch * ch * n,
            transcendentals=0,
            bytes_accessed=f.size * f.dtype.itemsize + n_split * bs * ch * ch * 4),
    )(f)
    if n_split == 1:
        return partial[0]
    return jnp.sum(partial, axis=0)


# ---------------------------------------------------------------------------
# Kernel 2: fused style loss (even-bs path).  For each batch b (N tiled):
#   g_b = (sum_k f_bk @ f_bk^T) / (ch*N);  partial_b = sum((g_b - gt_b)^2)
# Wrapper: loss = sum_b partial_b / (bs*ch*ch)  ==  F.mse_loss(gram, target).
# ---------------------------------------------------------------------------
def _style_loss_kernel(f_ref, gt_ref, out_ref, acc_ref, *, inv_scale, n, tile_n,
                       needs_mask, mxu_dtype):
    k = pl.program_id(1)

    @pl.when(k == 0)
    def _():
        acc_ref[...] = jnp.zeros_like(acc_ref)

    ft = f_ref[...]                               # (ch, tile_n), native dtype
    ft = _mask_and_cast(ft, n - k * tile_n, needs_mask, mxu_dtype)
    acc_ref[...] += lax.dot_general(
        ft, ft, dimension_numbers=(((1,), (1,)), ((), ())),
        preferred_element_type=jnp.float32)

    @pl.when(k == pl.num_programs(1) - 1)
    def _():
        # Target gram block index depends only on b -> DMA'd once per batch.
        g = acc_ref[...] * inv_scale
        diff = g - gt_ref[...].astype(jnp.float32)
        out_ref[...] = jnp.sum(diff * diff).reshape(1, 1)


def style_loss(input_nchw, target_gram, *, mxu_dtype=None, tile_n=None):
    bs, ch, h, w = input_nchw.shape
    n = h * w
    f = input_nchw.reshape(bs, ch, n)
    t_n, n_tiles = _choose_tiling(n, ch, f.dtype.itemsize, tile_n)

    if bs % 2 == 1 and n_tiles >= 2:
        # Split-K path (keeps both v7x TensorCores busy at bs == 1 / odd bs);
        # the O(ch^2) MSE epilogue is negligible, run it in plain JAX.
        g = gram_matrix(input_nchw, mxu_dtype=mxu_dtype, tile_n=tile_n)
        diff = g - target_gram.astype(jnp.float32)
        return jnp.sum(diff * diff) / (bs * ch * ch)

    needs_mask = (n % t_n != 0)
    kernel = functools.partial(
        _style_loss_kernel, inv_scale=1.0 / (ch * n), n=n, tile_n=t_n,
        needs_mask=needs_mask, mxu_dtype=mxu_dtype)
    per_batch = pl.pallas_call(
        kernel,
        out_shape=jax.ShapeDtypeStruct((bs, 1, 1), jnp.float32),
        grid_spec=pltpu.PrefetchScalarGridSpec(
            num_scalar_prefetch=0,
            grid=(bs, n_tiles),
            in_specs=[
                pl.BlockSpec((None, ch, t_n), lambda b, k: (b, 0, k)),
                pl.BlockSpec((None, ch, ch), lambda b, k: (b, 0, 0)),
            ],
            out_specs=pl.BlockSpec((None, 1, 1), lambda b, k: (b, 0, 0)),
            scratch_shapes=[pltpu.VMEM((ch, ch), jnp.float32)],
        ),
        compiler_params=pltpu.CompilerParams(
            dimension_semantics=("parallel", "arbitrary"),
            vmem_limit_bytes=_vmem_limit_bytes()),
        cost_estimate=pl.CostEstimate(
            flops=2 * bs * ch * ch * n,
            transcendentals=0,
            bytes_accessed=(f.size * f.dtype.itemsize
                            + target_gram.size * target_gram.dtype.itemsize
                            + bs * 4)),
    )(f, target_gram)
    # Tiny (bs,) reduction + MSE normalization in the JAX wrapper.
    return jnp.sum(per_batch) / (bs * ch * ch)


# ---------------------------------------------------------------------------
# StyleLossBlock equivalent: holds the target gram (computed with the Pallas
# kernel).  mxu_dtype=jnp.bfloat16 enables the in-kernel MXU cast (v6e/v7x perf
# option, lower precision); default keeps native/f32 semantics of the module.
# ---------------------------------------------------------------------------
class StyleLossBlockPallas:
    def __init__(self, target_nchw, *, mxu_dtype=None, tile_n=None):
        self.shape = target_nchw.shape
        self._mxu_dtype = mxu_dtype
        self._tile_n = tile_n
        self._target_gram_matrix = gram_matrix(
            target_nchw, mxu_dtype=mxu_dtype, tile_n=tile_n)

    def __call__(self, input_nchw):
        return style_loss(input_nchw, self._target_gram_matrix,
                          mxu_dtype=self._mxu_dtype, tile_n=self._tile_n)


if __name__ == "__main__":
    key = jax.random.PRNGKey(0)

    # pure-JAX reference
    def ref_gram(t):
        b, c, hh, ww = t.shape
        ff = t.reshape(b, c, hh * ww).astype(jnp.float32)
        return jnp.einsum("bcn,bdn->bcd", ff, ff,
                          preferred_element_type=jnp.float32) / (c * hh * ww)

    def ref_loss(x, t):
        return jnp.mean((ref_gram(x) - ref_gram(t)) ** 2)

    def check(shape, k, *, tile_n=None, mxu_dtype=None, rtol=5e-4, atol=1e-6):
        k_t, k_x = jax.random.split(k)
        target = jax.random.normal(k_t, shape, dtype=jnp.float32)
        x = jax.random.normal(k_x, shape, dtype=jnp.float32)
        block = StyleLossBlockPallas(target, mxu_dtype=mxu_dtype, tile_n=tile_n)
        loss = jax.block_until_ready(block(x))
        if mxu_dtype is not None:
            x_r = x.astype(mxu_dtype).astype(jnp.float32)
            t_r = target.astype(mxu_dtype).astype(jnp.float32)
            ref = ref_loss(x_r, t_r)
        else:
            ref = ref_loss(x, target)
        assert jnp.allclose(loss, ref, rtol=rtol, atol=atol), (shape, loss, ref)

    keys = jax.random.split(key, 5)
    # Small shape implied by the module: fused single-tile path.
    check((2, 4, 16, 16), keys[0])
    # Larger spatial extent, auto tile (single big lane-dense tile).
    check((2, 8, 64, 64), keys[1])
    # Even batch, forced multi-tile with a ragged (masked) final N tile.
    check((2, 8, 20, 30), keys[2], tile_n=128)
    # Odd batch -> split-K partial-gram path (v7x 2nd core), ragged + clamped tile.
    check((1, 8, 20, 30), keys[3], tile_n=128)
    # Optional in-kernel bf16 MXU cast (v6e/v7x perf option).
    check((2, 4, 16, 16), keys[4], mxu_dtype=jnp.bfloat16, rtol=2e-3, atol=1e-5)

    # Direct gram check on the split-K kernel path.
    xg = jax.random.normal(jax.random.PRNGKey(1), (1, 8, 20, 30), jnp.float32)
    g = jax.block_until_ready(gram_matrix(xg, tile_n=128))
    assert jnp.allclose(g, ref_gram(xg), rtol=5e-4, atol=1e-6)

    print("KERNEL_OK")
</pallas_src>

<mosaic_0001>
module attributes {stable_mosaic.version = 11 : i64} {
  func.func @_partial_gram_kernel(%arg0: i32, %arg1: i32, %arg2: i32, %arg3: memref<1x4x256xf32, #tpu.memory_space<vmem>>, %arg4: memref<1x1x4x4xf32, #tpu.memory_space<vmem>>) attributes {dimension_semantics = [#tpu.dimension_semantics<parallel>, #tpu.dimension_semantics<parallel>, #tpu.dimension_semantics<arbitrary>], iteration_bounds = array<i64: 1, 2, 1>, scalar_prefetch = 0 : i64, scratch_operands = 0 : i64, tpu.core_type = #tpu.core_type<tc>, window_params = [{transform_indices = @transform_0, window_bounds = array<i64: 1, 4, 256>}, {transform_indices = @transform_1, window_bounds = array<i64: 1, 1, 4, 4>}]} {
    %c0_i32 = arith.constant 0 : i32
    %0 = arith.cmpi eq, %arg2, %c0_i32 : i32
    %1 = arith.extui %0 : i1 to i32
    %c0_i32_0 = arith.constant 0 : i32
    %2 = arith.cmpi ne, %1, %c0_i32_0 : i32
    scf.if %2 {
      %cst_13 = arith.constant 0.000000e+00 : f32
      %15 = vector.broadcast %cst_13 : f32 to vector<4x4xf32>
      %c0_14 = arith.constant 0 : index
      %c0_15 = arith.constant 0 : index
      %c0_16 = arith.constant 0 : index
      %c0_17 = arith.constant 0 : index
      %16 = vector.load %arg4[%c0_14, %c0_15, %c0_16, %c0_17] : memref<1x1x4x4xf32, #tpu.memory_space<vmem>>, vector<1x1x4x4xf32>
      %17 = vector.shape_cast %16 : vector<1x1x4x4xf32> to vector<4x4xf32>
      %18 = vector.shape_cast %15 : vector<4x4xf32> to vector<1x1x4x4xf32>
      tpu.vector_store %arg4[%c0_14, %c0_15, %c0_16, %c0_17], %18 {strides = array<i32>} : memref<1x1x4x4xf32, #tpu.memory_space<vmem>>, vector<1x1x4x4xf32>,
    } else {
    }
    %c0 = arith.constant 0 : index
    %c0_1 = arith.constant 0 : index
    %c0_2 = arith.constant 0 : index
    %3 = vector.load %arg3[%c0, %c0_1, %c0_2] : memref<1x4x256xf32, #tpu.memory_space<vmem>>, vector<1x4x256xf32>
    %4 = vector.shape_cast %3 : vector<1x4x256xf32> to vector<4x256xf32>
    %c0_3 = arith.constant 0 : index
    %c0_4 = arith.constant 0 : index
    %c0_5 = arith.constant 0 : index
    %c0_6 = arith.constant 0 : index
    %5 = vector.load %arg4[%c0_3, %c0_4, %c0_5, %c0_6] : memref<1x1x4x4xf32, #tpu.memory_space<vmem>>, vector<1x1x4x4xf32>
    %6 = vector.shape_cast %5 : vector<1x1x4x4xf32> to vector<4x4xf32>
    %cst = arith.constant dense<0.000000e+00> : vector<4x4xf32>
    %7 = tpu.matmul %4, %4, %cst {dimension_numbers = #tpu.dot_dimension_numbers<[1], [1], [0], [0], [0, 0, 1, 0], [], []>} : vector<4x256xf32>, vector<4x256xf32>, vector<4x4xf32> -> vector<4x4xf32>
    %8 = arith.addf %6, %7 : vector<4x4xf32>
    %c0_7 = arith.constant 0 : index
    %c0_8 = arith.constant 0 : index
    %c0_9 = arith.constant 0 : index
    %c0_10 = arith.constant 0 : index
    %9 = vector.load %arg4[%c0_7, %c0_8, %c0_9, %c0_10] : memref<1x1x4x4xf32, #tpu.memory_space<vmem>>, vector<1x1x4x4xf32>
    %10 = vector.shape_cast %9 : vector<1x1x4x4xf32> to vector<4x4xf32>
    %11 = vector.shape_cast %8 : vector<4x4xf32> to vector<1x1x4x4xf32>
    tpu.vector_store %arg4[%c0_7, %c0_8, %c0_9, %c0_10], %11 {strides = array<i32>} : memref<1x1x4x4xf32, #tpu.memory_space<vmem>>, vector<1x1x4x4xf32>,
    %c0_i32_11 = arith.constant 0 : i32
    %12 = arith.cmpi eq, %arg2, %c0_i32_11 : i32
    %13 = arith.extui %12 : i1 to i32
    %c0_i32_12 = arith.constant 0 : i32
    %14 = arith.cmpi ne, %13, %c0_i32_12 : i32
    scf.if %14 {
      %c0_13 = arith.constant 0 : index
      %c0_14 = arith.constant 0 : index
      %c0_15 = arith.constant 0 : index
      %c0_16 = arith.constant 0 : index
      %15 = vector.load %arg4[%c0_13, %c0_14, %c0_15, %c0_16] : memref<1x1x4x4xf32, #tpu.memory_space<vmem>>, vector<1x1x4x4xf32>
      %16 = vector.shape_cast %15 : vector<1x1x4x4xf32> to vector<4x4xf32>
      %cst_17 = arith.constant 9.765625E-4 : f32
      %17 = vector.broadcast %cst_17 : f32 to vector<4x4xf32>
      %18 = arith.mulf %16, %17 : vector<4x4xf32>
      %c0_18 = arith.constant 0 : index
      %c0_19 = arith.constant 0 : index
      %c0_20 = arith.constant 0 : index
      %c0_21 = arith.constant 0 : index
      %19 = vector.load %arg4[%c0_18, %c0_19, %c0_20, %c0_21] : memref<1x1x4x4xf32, #tpu.memory_space<vmem>>, vector<1x1x4x4xf32>
      %20 = vector.shape_cast %19 : vector<1x1x4x4xf32> to vector<4x4xf32>
      %21 = vector.shape_cast %18 : vector<4x4xf32> to vector<1x1x4x4xf32>
      tpu.vector_store %arg4[%c0_18, %c0_19, %c0_20, %c0_21], %21 {strides = array<i32>} : memref<1x1x4x4xf32, #tpu.memory_space<vmem>>, vector<1x1x4x4xf32>,
    } else {
    }
    return
  }
  func.func @transform_0(%arg0: i32, %arg1: i32, %arg2: i32) -> (i32, i32, i32) {
    %c1_i32 = arith.constant 1 : i32
    %0 = arith.muli %arg0, %c1_i32 : i32
    %1 = arith.addi %0, %arg2 : i32
    %c0_i32 = arith.constant 0 : i32
    %c0_i32_0 = arith.constant 0 : i32
    return %arg1, %c0_i32, %1 : i32, i32, i32
  }
  func.func @transform_1(%arg0: i32, %arg1: i32, %arg2: i32) -> (i32, i32, i32, i32) {
    %c0_i32 = arith.constant 0 : i32
    %c0_i32_0 = arith.constant 0 : i32
    %c0_i32_1 = arith.constant 0 : i32
    return %arg0, %arg1, %c0_i32, %c0_i32_0 : i32, i32, i32, i32
  }
}

</mosaic_0001>

<bundles_post_ra>
// kernel: tpu_custom_call.1
= control target key start
LH: loop header
LB: loop body
LE: loop exit
PB: predicated region body
PF: predicated region fallthrough
CT: control target
= control target key end

     0   :  { %6 = vsyncpa [#allocation3], 0  ;;  %s738_s0 = inlined_call_operand.hbm [shape: f32[2,4,256], index: 0, kind: input, shape index: {}]   ;;  %s739_s1 = inlined_call_operand.hbm [shape: f32[1,2,4,4], index: 1, kind: output, shape index: {}]  }
   0x1   :  { %8 = vsyncpa [#allocation3 + $0x1], 0 }
   0x2   :  { %9 = vsyncpa [#allocation4], 0 }
   0x3   :  { %11 = vsyncpa [#allocation4 + $0x1], 0  ;;  %s562_s6 = smov 0   ;;  %s564_s7 = smov 0  }
   0x4   :  { %s566_s8 = smov 0   ;;  %s568_s9 = smov 0  }
   0x5   :  { %s570_s10 = smov 0   ;;  %s572_s11 = smov 0  }
   0x6 LB: > { %s356_s12 = sadd.s32 4294967295, %s547_s11   ;;  %s357_s13 = sadd.s32 4294967294, %s547_s11   ;;  %s547_s11 = sphi %s572_s11, %s17_s11   ;;  %s543_s10 = sphi %s570_s10, %s755_s10   ;;  %s539_s9 = sphi %s568_s9, %s754_s9   ;;  %s535_s8 = sphi %s566_s8, %s753_s8   ;;  %s531_s7 = sphi %s564_s7, %s752_s7   ;;  %s527_s6 = sphi %s562_s6, %s751_s6  }
   0x7   : > { %s32_s14 = sadd.s32 1, %s543_s10  ;;  %s47_s15 = sadd.s32 1, %s535_s8 }
   0x8   : > { %p34_p0 = scmp.ge.s32.totalorder %s32_s14, 2  ;;  %p54_p1 = scmp.ne.s32.totalorder %s535_s8, %s531_s7 }
   0x9   : > { %p55_p2 = scmp.eq.s32.totalorder %s547_s11, 0  ;;  %p60_p3 = scmp.ne.s32.totalorder %s531_s7, %s527_s6 }
   0xa   : > { %s757_s14 = smov (%p34_p0, %s32_s14), 0  ;;  %p61_p5 = scmp.eq.s32.totalorder %s356_s12, 0 }
   0xb   : > { %p603_p4 = por %p55_p2, %p54_p1  ;;  %s42_s17 = ssub.s32 %s543_s10, %s757_s14 }
   0xc   : > { %p86_p6 = scmp.eq.s32.totalorder %s356_s12, 1  ;;  %p45_p7 = scmp.eq.s32.totalorder %s42_s17, 0 }
   0xd   : > { %p609_p8 = por %p61_p5, %p60_p3  ;;  %p92_p10 = scmp.eq.s32.totalorder %s357_s13, 1 }
   0xe   : > { %p613_p9 = por %p86_p6, %p54_p1  ;;  %p383_p13 = scmp.lt.s32.totalorder %s547_s11, 2 }
   0xf   : > { %s618_s20 = scalar_select %p45_p7, %s535_s8, %s47_s15  }
  0x10   : > { %s743_s19 = scalar_select %p613_p9, 1, 0 }
  0x11   : > { %p620_p11 = por %p92_p10, %p60_p3  ;;  %s112_s22 = sand.u32 1, %s535_s8  }
  0x12   : > { %s360_s23 = sshll.u32 %s112_s22, 3  ;;  %s370_s24 = sshll.u32 %s543_s10, 7 }
  0x13   : > { %s744_s21 = scalar_select %p620_p11, 1, 0 }
  0x14   : > { %s631_s27 = scalar_lea.hbm %s738_s0, %s370_s24  ;;  %s116_s28 = scalar_lea.vmem [#allocation2], %s360_s23 }
  0x15   : > { %s127_s29 = sshll.u32 %s116_s28, 4  ;;  %p637_p0 = pnand %p383_p13, %p603_p4  ;;  %s633_s29 = int_to_ptr.vmem [resolvable:$true] %s127_s29 }
  0x16   : > { %s113_s2 = scalar_lea.sflag [#allocation3], %s112_s22  ;;  %s435_s3 = scalar_lea.hbm %s631_s27, 128 }
  0x17   : > { %p436_p3 = scmp.ne.s32.totalorder %s631_s27, %s435_s3  ;;  %p437_p5 = pneg %p637_p0 }
  0x18   : > { %s440_s12 = scalar_lea.hbm %s738_s0, 256  ;;  %p441_p4 = scmp.lt.u32.totalorder %s631_s27, %s738_s0 }
  0x19   : > { %p438_p6 = pnand %p437_p5, %p436_p3  ;;  %p442_p10 = scmp.lt.u32.totalorder %s440_s12, %s435_s3 }
  0x1a   : > { %p444_p12 = scmp.lt.u32.totalorder %s435_s3, %s631_s27 }
  0x1b   : > { %p439_p7 = pneg %p438_p6  ;;  %p443_p13 = por %p442_p10, %p441_p4 }
  0x1d   : > { %p445_p1 = por %p444_p12, %p443_p13 }
  0x1f   : > { %p446_p2 = pnand %p445_p1, %p439_p7 }
  0x21   : > { %449 = shalt.err (!%p446_p2)
}
  0x22   : > { %s450_s16 = scalar_lea.vmem %s633_s29, 128  ;;  %s549_s17 = smov [#allocation2]  }
  0x23   : > { %p451_p3 = scmp.ne.s32.totalorder %s633_s29, %s450_s16  ;;  %s455_s22 = sshll.u32 %s549_s17, 4  ;;  %s456_s22 = int_to_ptr.vmem [resolvable:$false] %s455_s22 }
  0x24   : > { %s457_s23 = scalar_lea.vmem %s456_s22, 256  ;;  %p458_p9 = scmp.lt.s32.totalorder %s633_s29, %s456_s22 }
  0x25   : > { %p453_p6 = pnand %p451_p3, %p437_p5  ;;  %p459_p4 = scmp.lt.s32.totalorder %s457_s23, %s450_s16 }
  0x27   : > { %p454_p11 = pneg %p453_p6  ;;  %p460_p10 = por %p459_p4, %p458_p9 }
  0x29   : > { %p461_p12 = pnand %p460_p10, %p454_p11 }
  0x2b   : > { %464 = shalt.err (!%p461_p12)
}
  0x2c   : > { %378 = dma.hbm_to_vmem [thread:$0]  (!%p637_p0), %s631_s27, 128, %s633_s29, %s113_s2  }
  0x2d   : > { %p746_p1 = scmp.lt.s32.totalorder %s547_s11, 3  ;;  %p747_p2 = scmp.ge.s32.totalorder %s547_s11, 1 }
  0x2f   : > { %p133_p5 = pnand %p747_p2, %p746_p1 }
  0x30   : > { %s673_s24 = sand.u32 (!%p133_p5), 1, %s531_s7  }
  0x31   : > { %136 = sbr.rel (%p133_p5) target bundleno = 302 (0x12e), region = 24  ;;  %s364_s25 = sshll.u32 (!%p133_p5), %s673_s24, 3 }
  0x32   : > { %s139_s26 = scalar_lea.sflag (!%p133_p5), [#allocation3], %s673_s24  ;;  %s142_s28 = scalar_lea.vmem (!%p133_p5), [#allocation2], %s364_s25 }
  0x38   : > { %518 = dma.done.wait (%p609_p8), %s139_s26, 128  }
  0x39   : > { %520 = vsyncadd (%p609_p8), %s139_s26, 4294967168  ;;  %s365_s27 = sshll.u32 %s673_s24, 2  ;;  %vm167_vm0 = vcmask 27648   ;;  %v550_v0 = vmov 0.0   ;;  %v169_v1 = vld [vmem:[%s142_s28] sm:$0xff]  ;;  %s367_s18 = sshll.u32 %s539_s9, 6 }
  0x3a   : > { %s160_s29 = scalar_lea.vmem [#allocation5], %s365_s27  ;;  %v172_v2 = vcombine.high %v169_v1, %v169_v1  ;;  %s688_s4 = scalar_lea.hbm %s739_s1, %s367_s18 }
  0x3b   : > { %168 = vst.msk [vmem:[%s160_s29] sm:$0xf] %vm167_vm0, %v550_v0  ;;  %s269_s30 = sshll.u32 %s160_s29, 4  ;;  %s254_s5 = scalar_lea.sflag [#allocation4], %s673_s24  ;;  %s690_s30 = int_to_ptr.vmem [resolvable:$true] %s269_s30 }
  0x3c   : > { %174 = vmatprep.subr.mxu0 %v172_v2  ;;  %238 = vmatprep.mubr.f32.mxu0 %v172_v2  ;;  %s465_s12 = scalar_lea.vmem %s690_s30, 64  ;;  %p748_p9 = scmp.ne.s32.totalorder %s743_s19, 0 }
  0x3d   : > { %175 = vmatpush1.xpose.msra.mxu0 %v169_v1  ;;  %p466_p8 = scmp.ne.s32.totalorder %s690_s30, %s465_s12  ;;  %s551_s9 = smov [#allocation5]  }
  0x3e   : > { %s469_s13 = sshll.u32 %s551_s9, 4  ;;  %s470_s13 = int_to_ptr.vmem [resolvable:$false] %s469_s13 }
  0x3f   : > { %p467_p11 = pnand %p466_p8, %p748_p9  ;;  %s471_s15 = scalar_lea.vmem %s470_s13, 128 }
  0x40   : > { %239 = vmatmul.mubr.f32.vlgmr.msra.gmra.mrb[0].mxu0 %v169_v1  ;;  %p472_p7 = scmp.lt.s32.totalorder %s690_s30, %s470_s13  ;;  %p473_p13 = scmp.lt.s32.totalorder %s471_s15, %s465_s12 }
  0x41   : > { %p468_p0 = pneg %p467_p11 }
  0x42   : > { %v170_v3 = vld [vmem:[%s160_s29] sm:$0xf]  ;;  %p474_p3 = por %p473_p13, %p472_p7 }
  0x44   : > { %p475_p6 = pnand %p474_p3, %p468_p0 }
 0x113   : > { %v240_v4 = vpop.f32.mrb[0].mxu0 }
 0x114   : > { %v244_v5 = vadd.f32 %v240_v4, %v170_v3  ;;  %v242_v6 = vpop.f32.mrb[1].mxu0 }
 0x116   : > { %246 = vst.msk [vmem:[%s160_s29] sm:$0xf] %vm167_vm0, %v244_v5 }
 0x11d   : > { %v250_v7 = vld [vmem:[%s160_s29] sm:$0xf] }
 0x11e   : > { %v251_v8 = vmul.f32 0.0009765625, %v250_v7 }
 0x120   : > { %252 = vst.msk [vmem:[%s160_s29] sm:$0xf] %vm167_vm0, %v251_v8 }
 0x121   : > { %478 = shalt.err (!%p475_p6)
}
 0x122   : > { %s479_s16 = scalar_lea.hbm %s688_s4, 64  ;;  %s483_s23 = scalar_lea.hbm %s739_s1, 128 }
 0x123   : > { %p480_p4 = scmp.ne.s32.totalorder %s688_s4, %s479_s16  ;;  %p484_p1 = scmp.lt.u32.totalorder %s688_s4, %s739_s1 }
 0x124   : > { %p485_p2 = scmp.lt.u32.totalorder %s483_s23, %s479_s16  ;;  %p487_p8 = scmp.lt.u32.totalorder %s479_s16, %s688_s4 }
 0x125   : > { %p481_p10 = pnand %p480_p4, %p748_p9 }
 0x126   : > { %p486_p5 = por %p485_p2, %p484_p1 }
 0x127   : > { %p482_p12 = pneg %p481_p10 }
 0x128   : > { %p488_p11 = por %p487_p8, %p486_p5 }
 0x12a   : > { %p489_p0 = pnand %p488_p11, %p482_p12 }
 0x12c   : > { %492 = shalt.err (!%p489_p0)
}
 0x12d   : > { %373 = dma.vmem_to_hbm [thread:$0]  (%p748_p9), %s690_s30, 64, %s688_s4, %s254_s5  }
 0x12e PF: > { %s281_s26 = sand.u32 1, %s527_s6   ;;  %p749_p7 = scmp.ne.s32.totalorder %s744_s21, 0 }
 0x12f   : > { %p750_p13 = scmp.ge.s32.totalorder %s547_s11, 2  ;;  %s282_s28 = scalar_lea.sflag [#allocation4], %s281_s26 }
 0x131   : > { %p380_p3 = pnand %p750_p13, %p749_p7 }
 0x133   : > { %522 = dma.done.wait (!%p380_p3), %s282_s28, 64  }
 0x134   : > { %524 = vsyncadd (!%p380_p3), %s282_s28, 4294967232  ;;  %s17_s11 = sadd.s32 1, %s547_s11   ;;  %s751_s6 = smov %s531_s7 }
 0x135   : > { %p14_p6 = scmp.ge.s32.totalorder %s17_s11, 4   ;;  %s752_s7 = smov %s535_s8 }
 0x136   : > { %s753_s8 = smov %s618_s20  ;;  %s754_s9 = smov %s543_s10 }
 0x137   : > { %s755_s10 = smov %s757_s14  ;;  %16 = sbr.rel (!%p14_p6) target bundleno = 6 (0x6), region = 77 }
 0x13e   :  { %287 = vsyncpa [#allocation3], 1 }
 0x13f   :  { %289 = vsyncpa [#allocation3 + $0x1], 1 }
 0x140   :  { %290 = vsyncpa [#allocation4], 1 }
 0x141   :  { %292 = vsyncpa [#allocation4 + $0x1], 1 }

</bundles_post_ra>
